<compile_context>
chip_gen: v5e
topology: v5e:2x2
jax: 0.10.0
libtpu: 0.0.40
codegen_flags: <defaults>
</compile_context>

<pallas_src>
import functools

import jax
import jax.numpy as jnp
from jax import lax
from jax.experimental import pallas as pl
from jax.experimental.pallas import tpu as pltpu

_MASK_VALUE = -1e30


def _round_up(x, m):
    return ((x + m - 1) // m) * m


def _l2_normalize(x, eps=1e-12):
    # matches torch.nn.functional.normalize(dim=-1): x / max(||x||_2, eps)
    # written as a single rsqrt (EUP) instead of sqrt + divide.
    sumsq = jnp.sum(x * x, axis=-1, keepdims=True)
    return x * lax.rsqrt(jnp.maximum(sumsq, eps * eps))


def _pad2(x, rows, cols):
    r, c = x.shape
    if r == rows and c == cols:
        return x
    return jnp.pad(x, ((0, rows - r), (0, cols - c)))


def _pick_tiles(N, M, Dp, block_n, block_m, mxu_bytes,
                vmem_budget=12 * 1024 * 1024):
    """Biggest tiles that fit a conservative VMEM budget (v5e default scoped=16MiB)."""
    bn = min(block_n, _round_up(N, 8))
    bm = min(block_m, _round_up(M, 8))

    def est(bn_, bm_):
        q_p = 2 * 2 * bn_ * Dp * 4               # query + positive f32, double-buffered
        nk = 2 * bm_ * Dp * mxu_bytes            # negatives, double-buffered
        scr = bn_ * Dp * mxu_bytes + 4 * bn_ * 4  # cached query + LSE accumulators
        return q_p + nk + scr

    while est(bn, bm) > vmem_budget and max(bn, bm) > 128:
        if bm >= bn and bm > 128:
            bm = _round_up(max(128, bm // 2), 8)
        elif bn > 128:
            bn = _round_up(max(128, bn // 2), 8)
        else:
            break
    return bn, bm


def _infonce_kernel(temp_ref,              # scalar prefetch (SMEM): [temperature]
                    q_ref, p_ref, nk_ref,  # inputs (VMEM tiles)
                    out_ref,               # output: per-row loss tile (block_n, 1)
                    qs_ref, pos_ref, m_ref, s_ref,  # VMEM scratch
                    *, m_total):
    j = pl.program_id(1)          # negatives (reduction) axis — innermost
    block_m = nk_ref.shape[0]

    # ---- per-N-tile init: normalize q/p once, fold 1/T into q, seed the online LSE
    @pl.when(j == 0)
    def _init():
        q = _l2_normalize(q_ref[...].astype(jnp.float32))
        p = _l2_normalize(p_ref[...].astype(jnp.float32))
        q = q * (1.0 / temp_ref[0])                          # fold 1/T into q once
        pos = jnp.sum(q * p, axis=-1, keepdims=True)         # (bn, 1), already / T
        qs_ref[...] = q.astype(qs_ref.dtype)                 # cached MXU operand
        pos_ref[...] = pos
        # fold the positive column into the running log-sum-exp state
        m_ref[...] = pos
        s_ref[...] = jnp.ones_like(pos)

    # ---- negatives tile: already L2-normalized + cast in the wrapper
    # "NT" contraction on the MXU without materializing nk.T
    neg = lax.dot_general(qs_ref[...], nk_ref[...],
                          dimension_numbers=(((1,), (1,)), ((), ())),
                          preferred_element_type=jnp.float32)  # (bn, bm)

    # mask padded negative columns — emitted only when M % block_m != 0 (static)
    if m_total is not None:
        col = j * block_m + lax.broadcasted_iota(jnp.int32, neg.shape, 1)
        neg = jnp.where(col < m_total, neg, _MASK_VALUE)

    # ---- online log-sum-exp update
    m_prev = m_ref[...]
    m_new = jnp.maximum(m_prev, jnp.max(neg, axis=-1, keepdims=True))
    s_ref[...] = (s_ref[...] * jnp.exp(m_prev - m_new)
                  + jnp.sum(jnp.exp(neg - m_new), axis=-1, keepdims=True))
    m_ref[...] = m_new

    # ---- finalize: per-row loss = logsumexp([pos, neg]) - pos
    @pl.when(j == pl.num_programs(1) - 1)
    def _finalize():
        out_ref[...] = m_ref[...] + jnp.log(s_ref[...]) - pos_ref[...]


def info_nce_pallas(query, positive_key, negative_keys, temperature,
                    reduction='mean', block_n=512, block_m=1024,
                    mxu_dtype=jnp.bfloat16):
    """InfoNCE loss, negative_mode='unpaired' (the module default)."""
    # TODO(synk): negative_mode='paired' and negative_keys=None branches of the
    # original module are not implemented (module default is 'unpaired').
    assert query.ndim == 2 and positive_key.ndim == 2 and negative_keys.ndim == 2
    assert query.shape == positive_key.shape
    assert query.shape[-1] == negative_keys.shape[-1]

    N, D = query.shape
    M = negative_keys.shape[0]

    # Normalize negatives ONCE (with an N-tile grid every negatives tile would
    # otherwise be re-normalized num_N_tiles times) and cast to the MXU dtype so the
    # dominant streamed operand uses half the HBM bandwidth / VMEM.
    nk = _l2_normalize(negative_keys.astype(jnp.float32)).astype(mxu_dtype)

    Dp = _round_up(D, 128)                     # lane-dense contraction dim
    mxu_bytes = jnp.dtype(mxu_dtype).itemsize
    bn, bm = _pick_tiles(N, M, Dp, block_n, block_m, mxu_bytes)
    Np = _round_up(N, bn)
    Mp = _round_up(M, bm)

    q = _pad2(query.astype(jnp.float32), Np, Dp)
    p = _pad2(positive_key.astype(jnp.float32), Np, Dp)
    nk = _pad2(nk, Mp, Dp)
    temp = jnp.asarray([temperature], dtype=jnp.float32)

    grid = (Np // bn, Mp // bm)
    kernel = functools.partial(_infonce_kernel,
                               m_total=int(M) if Mp != M else None)

    losses = pl.pallas_call(
        kernel,
        out_shape=jax.ShapeDtypeStruct((Np, 1), jnp.float32),
        grid_spec=pltpu.PrefetchScalarGridSpec(
            num_scalar_prefetch=1,                  # temperature -> SMEM
            grid=grid,
            in_specs=[
                pl.BlockSpec((bn, Dp), lambda i, j, t: (i, 0)),   # query
                pl.BlockSpec((bn, Dp), lambda i, j, t: (i, 0)),   # positive_key
                pl.BlockSpec((bm, Dp), lambda i, j, t: (j, 0)),   # negative_keys
            ],
            out_specs=pl.BlockSpec((bn, 1), lambda i, j, t: (i, 0)),
            scratch_shapes=[
                pltpu.VMEM((bn, Dp), mxu_dtype),     # cached normalized/scaled query
                pltpu.VMEM((bn, 1), jnp.float32),    # positive logit
                pltpu.VMEM((bn, 1), jnp.float32),    # running max
                pltpu.VMEM((bn, 1), jnp.float32),    # running sum-exp
            ],
        ),
        compiler_params=pltpu.CompilerParams(
            dimension_semantics=("parallel", "arbitrary")),
    )(temp, q, p, nk)

    per_sample = losses[:N, 0]
    if reduction == 'mean':
        return jnp.mean(per_sample)
    if reduction == 'sum':
        return jnp.sum(per_sample)
    return per_sample


def info_nce_ref(query, positive_key, negative_keys, temperature):
    # Pure-JAX reference mirroring the PyTorch semantics.
    q = _l2_normalize(query.astype(jnp.float32))
    p = _l2_normalize(positive_key.astype(jnp.float32))
    nk = _l2_normalize(negative_keys.astype(jnp.float32))
    pos = jnp.sum(q * p, axis=1, keepdims=True)
    neg = q @ nk.T
    logits = jnp.concatenate([pos, neg], axis=1) / temperature
    lse = jax.scipy.special.logsumexp(logits, axis=1)
    return jnp.mean(lse - logits[:, 0])


if __name__ == "__main__":
    # InfoNCE has no learnable parameters; inputs are embeddings.
    N, M, D = 8, 16, 32
    key = jax.random.PRNGKey(0)
    kq, kp, kn = jax.random.split(key, 3)
    query = jax.random.normal(kq, (N, D), dtype=jnp.float32)
    positive_key = jax.random.normal(kp, (N, D), dtype=jnp.float32)
    negative_keys = jax.random.normal(kn, (M, D), dtype=jnp.float32)
    temperature = 0.1

    ref = info_nce_ref(query, positive_key, negative_keys, temperature)

    # exact-path check (f32 MXU operands)
    loss_f32 = info_nce_pallas(query, positive_key, negative_keys, temperature,
                               mxu_dtype=jnp.float32)
    jax.block_until_ready(loss_f32)
    assert jnp.allclose(loss_f32, ref, atol=1e-4, rtol=1e-4), (loss_f32, ref)

    # default fast path (bf16 MXU operands, f32 accumulation) — looser tolerance
    loss = info_nce_pallas(query, positive_key, negative_keys, temperature)
    jax.block_until_ready(loss)
    assert jnp.allclose(loss, ref, atol=3e-2, rtol=3e-2), (loss, ref)

    # multi-tile path: exercises the online LSE across several negative/query tiles
    # plus N/M/D padding and ragged-column masking.
    N2, M2, D2 = 20, 300, 96
    kq2, kp2, kn2 = jax.random.split(jax.random.PRNGKey(1), 3)
    q2 = jax.random.normal(kq2, (N2, D2), dtype=jnp.float32)
    p2 = jax.random.normal(kp2, (N2, D2), dtype=jnp.float32)
    n2 = jax.random.normal(kn2, (M2, D2), dtype=jnp.float32)
    ref2 = info_nce_ref(q2, p2, n2, 0.07)
    loss2 = info_nce_pallas(q2, p2, n2, 0.07, mxu_dtype=jnp.float32,
                            block_n=8, block_m=128)
    jax.block_until_ready(loss2)
    assert jnp.allclose(loss2, ref2, atol=1e-4, rtol=1e-4), (loss2, ref2)

    # mask-free aligned path (M a multiple of the M tile -> no column mask emitted)
    N3, M3, D3 = 16, 256, 64
    kq3, kp3, kn3 = jax.random.split(jax.random.PRNGKey(2), 3)
    q3 = jax.random.normal(kq3, (N3, D3), dtype=jnp.float32)
    p3 = jax.random.normal(kp3, (N3, D3), dtype=jnp.float32)
    n3 = jax.random.normal(kn3, (M3, D3), dtype=jnp.float32)
    ref3 = info_nce_ref(q3, p3, n3, 0.5)
    loss3 = info_nce_pallas(q3, p3, n3, 0.5, mxu_dtype=jnp.float32,
                            block_n=16, block_m=128)
    jax.block_until_ready(loss3)
    assert jnp.allclose(loss3, ref3, atol=1e-4, rtol=1e-4), (loss3, ref3)

    print("KERNEL_OK")
</pallas_src>

<mosaic_0001>
module attributes {stable_mosaic.version = 11 : i64} {
  func.func @_infonce_kernel(%arg0: i32, %arg1: i32, %arg2: memref<1xf32, #tpu.memory_space<smem>>, %arg3: memref<8x128xf32, #tpu.memory_space<vmem>>, %arg4: memref<8x128xf32, #tpu.memory_space<vmem>>, %arg5: memref<16x128xf32, #tpu.memory_space<vmem>>, %arg6: memref<8x1xf32, #tpu.memory_space<vmem>>, %arg7: memref<8x128xf32, #tpu.memory_space<vmem>>, %arg8: memref<8x1xf32, #tpu.memory_space<vmem>>, %arg9: memref<8x1xf32, #tpu.memory_space<vmem>>, %arg10: memref<8x1xf32, #tpu.memory_space<vmem>>) attributes {dimension_semantics = [#tpu.dimension_semantics<parallel>, #tpu.dimension_semantics<arbitrary>], iteration_bounds = array<i64: 1, 1>, scalar_prefetch = 1 : i64, scratch_operands = 4 : i64, tpu.core_type = #tpu.core_type<tc>, window_params = [{transform_indices = @transform_0, window_bounds = array<i64: 8, 128>}, {transform_indices = @transform_1, window_bounds = array<i64: 8, 128>}, {transform_indices = @transform_2, window_bounds = array<i64: 16, 128>}, {transform_indices = @transform_3, window_bounds = array<i64: 8, 1>}]} {
    %c0_i32 = arith.constant 0 : i32
    %0 = arith.cmpi eq, %arg1, %c0_i32 : i32
    %1 = arith.extui %0 : i1 to i32
    %c0_i32_0 = arith.constant 0 : i32
    %2 = arith.cmpi ne, %1, %c0_i32_0 : i32
    scf.if %2 {
      %c0_16 = arith.constant 0 : index
      %c0_17 = arith.constant 0 : index
      %25 = vector.load %arg3[%c0_16, %c0_17] : memref<8x128xf32, #tpu.memory_space<vmem>>, vector<8x128xf32>
      %26 = arith.mulf %25, %25 : vector<8x128xf32>
      %cst_18 = arith.constant dense<0.000000e+00> : vector<8xf32>
      %27 = vector.multi_reduction <add>, %26, %cst_18 [1] : vector<8x128xf32> to vector<8xf32>
      %28 = vector.shape_cast %27 : vector<8xf32> to vector<8x1xf32>
      %cst_19 = arith.constant 1.000000e-24 : f32
      %29 = vector.broadcast %cst_19 : f32 to vector<8x1xf32>
      %30 = arith.maximumf %28, %29 : vector<8x1xf32>
      %31 = math.rsqrt %30 : vector<8x1xf32>
      %32 = vector.broadcast %31 : vector<8x1xf32> to vector<8x128xf32>
      %33 = arith.mulf %25, %32 : vector<8x128xf32>
      %c0_20 = arith.constant 0 : index
      %c0_21 = arith.constant 0 : index
      %34 = vector.load %arg4[%c0_20, %c0_21] : memref<8x128xf32, #tpu.memory_space<vmem>>, vector<8x128xf32>
      %35 = arith.mulf %34, %34 : vector<8x128xf32>
      %cst_22 = arith.constant dense<0.000000e+00> : vector<8xf32>
      %36 = vector.multi_reduction <add>, %35, %cst_22 [1] : vector<8x128xf32> to vector<8xf32>
      %37 = vector.shape_cast %36 : vector<8xf32> to vector<8x1xf32>
      %cst_23 = arith.constant 1.000000e-24 : f32
      %38 = vector.broadcast %cst_23 : f32 to vector<8x1xf32>
      %39 = arith.maximumf %37, %38 : vector<8x1xf32>
      %40 = math.rsqrt %39 : vector<8x1xf32>
      %41 = vector.broadcast %40 : vector<8x1xf32> to vector<8x128xf32>
      %42 = arith.mulf %34, %41 : vector<8x128xf32>
      %c0_24 = arith.constant 0 : index
      %43 = memref.load %arg2[%c0_24] : memref<1xf32, #tpu.memory_space<smem>>
      %cst_25 = arith.constant 1.000000e+00 : f32
      %44 = arith.divf %cst_25, %43 : f32
      %45 = vector.broadcast %44 : f32 to vector<8x128xf32>
      %46 = arith.mulf %33, %45 : vector<8x128xf32>
      %47 = arith.mulf %46, %42 : vector<8x128xf32>
      %cst_26 = arith.constant dense<0.000000e+00> : vector<8xf32>
      %48 = vector.multi_reduction <add>, %47, %cst_26 [1] : vector<8x128xf32> to vector<8xf32>
      %49 = vector.shape_cast %48 : vector<8xf32> to vector<8x1xf32>
      %c0_27 = arith.constant 0 : index
      %c0_28 = arith.constant 0 : index
      %50 = vector.load %arg7[%c0_27, %c0_28] : memref<8x128xf32, #tpu.memory_space<vmem>>, vector<8x128xf32>
      tpu.vector_store %arg7[%c0_27, %c0_28], %46 {strides = array<i32>} : memref<8x128xf32, #tpu.memory_space<vmem>>, vector<8x128xf32>,
      %c0_29 = arith.constant 0 : index
      %c0_30 = arith.constant 0 : index
      %51 = vector.load %arg8[%c0_29, %c0_30] : memref<8x1xf32, #tpu.memory_space<vmem>>, vector<8x1xf32>
      tpu.vector_store %arg8[%c0_29, %c0_30], %49 {strides = array<i32>} : memref<8x1xf32, #tpu.memory_space<vmem>>, vector<8x1xf32>,
      %c0_31 = arith.constant 0 : index
      %c0_32 = arith.constant 0 : index
      %52 = vector.load %arg9[%c0_31, %c0_32] : memref<8x1xf32, #tpu.memory_space<vmem>>, vector<8x1xf32>
      tpu.vector_store %arg9[%c0_31, %c0_32], %49 {strides = array<i32>} : memref<8x1xf32, #tpu.memory_space<vmem>>, vector<8x1xf32>,
      %cst_33 = arith.constant 1.000000e+00 : f32
      %53 = vector.broadcast %cst_33 : f32 to vector<8x1xf32>
      %c0_34 = arith.constant 0 : index
      %c0_35 = arith.constant 0 : index
      %54 = vector.load %arg10[%c0_34, %c0_35] : memref<8x1xf32, #tpu.memory_space<vmem>>, vector<8x1xf32>
      tpu.vector_store %arg10[%c0_34, %c0_35], %53 {strides = array<i32>} : memref<8x1xf32, #tpu.memory_space<vmem>>, vector<8x1xf32>,
    } else {
    }
    %c0 = arith.constant 0 : index
    %c0_1 = arith.constant 0 : index
    %3 = vector.load %arg7[%c0, %c0_1] : memref<8x128xf32, #tpu.memory_space<vmem>>, vector<8x128xf32>
    %c0_2 = arith.constant 0 : index
    %c0_3 = arith.constant 0 : index
    %4 = vector.load %arg5[%c0_2, %c0_3] : memref<16x128xf32, #tpu.memory_space<vmem>>, vector<16x128xf32>
    %cst = arith.constant dense<0.000000e+00> : vector<8x16xf32>
    %5 = tpu.matmul %3, %4, %cst {dimension_numbers = #tpu.dot_dimension_numbers<[1], [1], [0], [0], [0, 0, 1, 0], [], []>} : vector<8x128xf32>, vector<16x128xf32>, vector<8x16xf32> -> vector<8x16xf32>
    %c0_4 = arith.constant 0 : index
    %c0_5 = arith.constant 0 : index
    %6 = vector.load %arg9[%c0_4, %c0_5] : memref<8x1xf32, #tpu.memory_space<vmem>>, vector<8x1xf32>
    %cst_6 = arith.constant dense<0xFF800000> : vector<8xf32>
    %7 = vector.multi_reduction <maximumf>, %5, %cst_6 [1] : vector<8x16xf32> to vector<8xf32>
    %8 = vector.shape_cast %7 : vector<8xf32> to vector<8x1xf32>
    %9 = arith.maximumf %6, %8 : vector<8x1xf32>
    %c0_7 = arith.constant 0 : index
    %c0_8 = arith.constant 0 : index
    %10 = vector.load %arg10[%c0_7, %c0_8] : memref<8x1xf32, #tpu.memory_space<vmem>>, vector<8x1xf32>
    %11 = arith.subf %6, %9 : vector<8x1xf32>
    %12 = math.exp %11 : vector<8x1xf32>
    %13 = arith.mulf %10, %12 : vector<8x1xf32>
    %14 = vector.broadcast %9 : vector<8x1xf32> to vector<8x16xf32>
    %15 = arith.subf %5, %14 : vector<8x16xf32>
    %16 = math.exp %15 : vector<8x16xf32>
    %cst_9 = arith.constant dense<0.000000e+00> : vector<8xf32>
    %17 = vector.multi_reduction <add>, %16, %cst_9 [1] : vector<8x16xf32> to vector<8xf32>
    %18 = vector.shape_cast %17 : vector<8xf32> to vector<8x1xf32>
    %19 = arith.addf %13, %18 : vector<8x1xf32>
    %c0_10 = arith.constant 0 : index
    %c0_11 = arith.constant 0 : index
    %20 = vector.load %arg10[%c0_10, %c0_11] : memref<8x1xf32, #tpu.memory_space<vmem>>, vector<8x1xf32>
    tpu.vector_store %arg10[%c0_10, %c0_11], %19 {strides = array<i32>} : memref<8x1xf32, #tpu.memory_space<vmem>>, vector<8x1xf32>,
    %c0_12 = arith.constant 0 : index
    %c0_13 = arith.constant 0 : index
    %21 = vector.load %arg9[%c0_12, %c0_13] : memref<8x1xf32, #tpu.memory_space<vmem>>, vector<8x1xf32>
    tpu.vector_store %arg9[%c0_12, %c0_13], %9 {strides = array<i32>} : memref<8x1xf32, #tpu.memory_space<vmem>>, vector<8x1xf32>,
    %c0_i32_14 = arith.constant 0 : i32
    %22 = arith.cmpi eq, %arg1, %c0_i32_14 : i32
    %23 = arith.extui %22 : i1 to i32
    %c0_i32_15 = arith.constant 0 : i32
    %24 = arith.cmpi ne, %23, %c0_i32_15 : i32
    scf.if %24 {
      %c0_16 = arith.constant 0 : index
      %c0_17 = arith.constant 0 : index
      %25 = vector.load %arg9[%c0_16, %c0_17] : memref<8x1xf32, #tpu.memory_space<vmem>>, vector<8x1xf32>
      %c0_18 = arith.constant 0 : index
      %c0_19 = arith.constant 0 : index
      %26 = vector.load %arg10[%c0_18, %c0_19] : memref<8x1xf32, #tpu.memory_space<vmem>>, vector<8x1xf32>
      %27 = math.log %26 : vector<8x1xf32>
      %28 = arith.addf %25, %27 : vector<8x1xf32>
      %c0_20 = arith.constant 0 : index
      %c0_21 = arith.constant 0 : index
      %29 = vector.load %arg8[%c0_20, %c0_21] : memref<8x1xf32, #tpu.memory_space<vmem>>, vector<8x1xf32>
      %30 = arith.subf %28, %29 : vector<8x1xf32>
      %c0_22 = arith.constant 0 : index
      %c0_23 = arith.constant 0 : index
      %31 = vector.load %arg6[%c0_22, %c0_23] : memref<8x1xf32, #tpu.memory_space<vmem>>, vector<8x1xf32>
      tpu.vector_store %arg6[%c0_22, %c0_23], %30 {strides = array<i32>} : memref<8x1xf32, #tpu.memory_space<vmem>>, vector<8x1xf32>,
    } else {
    }
    return
  }
  func.func @transform_0(%arg0: i32, %arg1: i32, %arg2: memref<1xf32, #tpu.memory_space<smem>>) -> (i32, i32) {
    %c0_i32 = arith.constant 0 : i32
    %c0_i32_0 = arith.constant 0 : i32
    return %arg0, %c0_i32 : i32, i32
  }
  func.func @transform_1(%arg0: i32, %arg1: i32, %arg2: memref<1xf32, #tpu.memory_space<smem>>) -> (i32, i32) {
    %c0_i32 = arith.constant 0 : i32
    %c0_i32_0 = arith.constant 0 : i32
    return %arg0, %c0_i32 : i32, i32
  }
  func.func @transform_2(%arg0: i32, %arg1: i32, %arg2: memref<1xf32, #tpu.memory_space<smem>>) -> (i32, i32) {
    %c0_i32 = arith.constant 0 : i32
    %c0_i32_0 = arith.constant 0 : i32
    return %arg1, %c0_i32 : i32, i32
  }
  func.func @transform_3(%arg0: i32, %arg1: i32, %arg2: memref<1xf32, #tpu.memory_space<smem>>) -> (i32, i32) {
    %c0_i32 = arith.constant 0 : i32
    %c0_i32_0 = arith.constant 0 : i32
    return %arg0, %c0_i32 : i32, i32
  }
}

</mosaic_0001>

<bundles_post_ra>
// kernel: tpu_custom_call.1
= control target key start
LH: loop header
LB: loop body
LE: loop exit
PB: predicated region body
PF: predicated region fallthrough
CT: control target
= control target key end

     0   :  { %10 = vsyncpa [#allocation9], 0  ;;  %s342_s0 = inlined_call_operand.<no memory space> [shape: f32[1], index: 0, kind: input, shape index: {}]   ;;  %s343_s1 = inlined_call_operand.hbm [shape: f32[8,128], index: 1, kind: input, shape index: {}]   ;;  %s344_s2 = inlined_call_operand.hbm [shape: f32[8,128], index: 2, kind: input, shape index: {}]   ;;  %s345_s3 = inlined_call_operand.hbm [shape: f32[16,128], index: 3, kind: input, shape index: {}]   ;;  %s346_s4 = inlined_call_operand.vmem [shape: f32[8,1], index: 4, kind: output, shape index: {}]  }
   0x1   :  { %11 = vsyncpa [#allocation11], 0  ;;  %s28_s17 = sshll.u32 %s344_s2, 4  ;;  %s287_s18 = smov [#allocation10]   ;;  %s29_s17 = int_to_ptr.hbm [resolvable:$true] %s28_s17 }
   0x2   :  { %s30_s19 = sshll.u32 %s287_s18, 4  ;;  %s17_s22 = sshll.u32 %s343_s1, 4  ;;  %s31_s19 = int_to_ptr.vmem [resolvable:$true] %s30_s19  ;;  %s18_s22 = int_to_ptr.hbm [resolvable:$true] %s17_s22 }
   0x3   :  { %33 = dma.hbm_to_vmem [thread:$0]  %s29_s17, 128, %s31_s19, [#allocation11]  }
   0x4   :  { %s288_s23 = smov [#allocation8]   ;;  %s38_s27 = sshll.u32 %s345_s3, 4  ;;  %s39_s27 = int_to_ptr.hbm [resolvable:$true] %s38_s27 }
   0x5   :  { %s19_s24 = sshll.u32 %s288_s23, 4  ;;  %s289_s2 = smov [#allocation12]   ;;  %s20_s24 = int_to_ptr.vmem [resolvable:$true] %s19_s24 }
   0x6   :  { %22 = dma.hbm_to_vmem [thread:$0]  %s18_s22, 128, %s20_s24, [#allocation9]  }
   0x7   :  { %s40_s28 = sshll.u32 %s289_s2, 4  ;;  %s290_s29 = smov 128   ;;  %s41_s28 = int_to_ptr.vmem [resolvable:$true] %s40_s28 }
   0x8   :  { %s291_s30 = smov 8  }
   0x9   :  { %46 = dma.hbm_to_vmem [thread:$0]  %s39_s27, 256, %s41_s28, [#allocation11], %s290_s29, %s290_s29, %s291_s30  }
   0xa   :  { %283 = dma.done.wait [#allocation9], 128  }
   0xb   :  { %284 = vsyncadd [#allocation9], 4294967168 }
   0xc   :  { %285 = dma.done.wait [#allocation11], 384  }
   0xd   :  { %286 = vsyncadd [#allocation11], 4294966912  ;;  %v96_v0 = vstv %s342_s0  ;;  %v63_v2 = vld [vmem:[#allocation8] sm:$0xff]  ;;  %v79_v8 = vld [vmem:[#allocation10] sm:$0xff]  ;;  %vm118_vm10 = vcmask 7168   ;;  %vm146_vm11 = vcmask 130048  }
   0xe   :  { %199 = vrcp.f32 %v96_v0  ;;  %v64_v3 = vmul.f32 %v63_v2, %v63_v2  ;;  %v108_v5 = vand.u32 2147483648, %v96_v0  ;;  %vm102_vm0 = vweird.f32 %v96_v0  ;;  %v124_v15 = vld [vmem:[#allocation12 + $0x8] sm:$0xff]  ;;  %v123_v16 = vld [vmem:[#allocation12] sm:$0xff] }
   0xf   :  { %v106_v7 = vand.u32 2147483647, %v96_v0  ;;  %v80_v11 = vmul.f32 %v79_v8, %v79_v8  ;;  %139 = vmatpush.xpose.msra.mxu0 %v124_v15  ;;  %v292_v43 = vmov 0   ;;  %v293_v44 = vmov 1.0  }
  0x10   :  { %65 = vadd.xlane.f32.xlu0 %v64_v3  ;;  %v109_v10 = vor.u32 1.1754944e-38, %v108_v5  ;;  %197 = vset.pattern.permute.xlu2 %v292_v43  ;;  %121 = vst.msk [vmem:[#allocation5] sm:$0xff] %vm118_vm10, %v293_v44 }
  0x11   :  { %vm107_vm3 = vcmp.eq.f32.partialorder %v106_v7, 8.507059e+37  ;;  %198 = vset.pattern.permute.xlu0 %v292_v43 }
  0x13   :  { %140 = vmatpush.xpose.msra.mxu0 %v123_v16 }
  0x14   :  { %v200_v1 = vpop.eup %199 }
  0x15   :  { %v98_v4 = vmul.f32 %v200_v1, %v96_v0  ;;  %vm103_vm1 = vweird.f32 %v200_v1 }
  0x16   :  { %vm104_vm2 = vmor %vm102_vm0, %vm103_vm1 }
  0x17   :  { %v99_v6 = vsub.f32 1.0, %v98_v4  ;;  %v151_v56 = vld [vmem:[#allocation5] sm:$0xff] }
  0x18   :  { %81 = vadd.xlane.f32.xlu0 %v80_v11 }
  0x19   :  { %v100_v9 = vmul.f32 %v200_v1, %v99_v6 }
  0x1b   :  { %v101_v12 = vadd.f32 %v200_v1, %v100_v9 }
  0x1d   :  { %v105_v13 = vsel %vm104_vm2, %v200_v1, %v101_v12 }
  0x1e   :  { %v110_v14 = vsel %vm107_vm3, %v109_v10, %v105_v13 }
  0x1f   :  { %188 = vpush %v110_v14 }
  0x50   :  { %s189_s0 = spop %188 }
  0x51   :  { %v112_v31 = vstv %s189_s0 }
  0x83   :  { %v66_v17 = vpop.xlane.xlu0 %65 }
  0x84   :  { %v67_v18 = vmax.f32 %v66_v17, 1e-24 }
  0x86   :  { %201 = vrsqrt.f32 %v67_v18  ;;  %vm74_vm5 = vweird.f32 %v67_v18 }
  0x8b   :  { %v82_v19 = vpop.xlane.xlu0 %81 }
  0x8c   :  { %v202_v20 = vpop.eup %201  ;;  %v83_v21 = vmax.f32 %v82_v19, 1e-24 }
  0x8d   :  { %v69_v22 = vmul.f32 %v202_v20, %v67_v18  ;;  %vm75_vm4 = vweird.f32 %v202_v20 }
  0x8e   :  { %203 = vrsqrt.f32 %v83_v21  ;;  %vm76_vm6 = vmor %vm74_vm5, %vm75_vm4  ;;  %vm90_vm7 = vweird.f32 %v83_v21 }
  0x8f   :  { %v70_v23 = vmul.f32 %v202_v20, %v69_v22 }
  0x91   :  { %v71_v24 = vmul.f32 0.5, %v70_v23 }
  0x93   :  { %v72_v25 = vsub.f32 1.5, %v71_v24 }
  0x94   :  { %v204_v26 = vpop.eup %203 }
  0x95   :  { %v85_v27 = vmul.f32 %v204_v26, %v83_v21  ;;  %v73_v28 = vmul.f32 %v202_v20, %v72_v25  ;;  %vm91_vm8 = vweird.f32 %v204_v26 }
  0x96   :  { %vm92_vm9 = vmor %vm90_vm7, %vm91_vm8 }
  0x97   :  { %v86_v29 = vmul.f32 %v204_v26, %v85_v27  ;;  %v77_v30 = vsel %vm76_vm6, %v202_v20, %v73_v28 }
  0x98   :  { %v78_v32 = vmul.f32 %v77_v30, %v63_v2 }
  0x99   :  { %v87_v33 = vmul.f32 0.5, %v86_v29 }
  0x9a   :  { %v113_v34 = vmul.f32 %v112_v31, %v78_v32 }
  0x9b   :  { %v88_v35 = vsub.f32 1.5, %v87_v33 }
  0x9c   :  { %141 = vmatmul.f32.vlgmr.msra.gmra.mxu0 %v113_v34 }
  0x9d   :  { %v89_v36 = vmul.f32 %v204_v26, %v88_v35 }
  0x9f   :  { %v93_v37 = vsel %vm92_vm9, %v204_v26, %v89_v36 }
  0xa0   :  { %v94_v38 = vmul.f32 %v93_v37, %v79_v8 }
  0xa2   :  { %v114_v39 = vmul.f32 %v113_v34, %v94_v38 }
  0xa4   :  { %115 = vadd.xlane.f32.xlu1 %v114_v39 }
 0x117   :  { %v116_v40 = vpop.xlane.xlu1 %115 }
 0x118   :  { %119 = vst.msk [vmem:[#allocation3] sm:$0xff] %vm118_vm10, %v116_v40 }
 0x119   :  { %120 = vst.msk [vmem:[#allocation4] sm:$0xff] %vm118_vm10, %v116_v40  ;;  %v142_v41 = vpop.f32.mrf.mxu0 }
 0x11a   :  { %v147_v42 = vsel %vm146_vm11, %v142_v41, -inf }
 0x11b   :  { %148 = vmax.xlane.f32.xlu1 %v147_v42 }
 0x11f   :  { %v179_v1 = vld [vmem:[#allocation3] sm:$0xff] }
 0x120   :  { %v145_v45 = vld [vmem:[#allocation4] sm:$0xff] }
 0x18e   :  { %v149_v46 = vpop.xlane.xlu1 %148 }
 0x18f   :  { %v150_v47 = vmax.f32 %v145_v45, %v149_v46 }
 0x191   :  { %v152_v48 = vsub.f32 %v145_v45, %v150_v47  ;;  %170 = vst.msk [vmem:[#allocation4] sm:$0xff] %vm118_vm10, %v150_v47  ;;  %158 = vperm.xlu2 %197, %v150_v47  }
 0x193   :  { %v153_v54 = vmul.f32 1.442695, %v152_v48 }
 0x198   :  { %v174_v63 = vld [vmem:[#allocation4] sm:$0xff] }
 0x1eb   :  { %v159_v49 = vpop.permute.xlu2 %158 }
 0x1ec   :  { %v161_v50 = vsub.f32 %v142_v41, %v159_v49 }
 0x1ee   :  { %v162_v51 = vmul.f32 1.442695, %v161_v50 }
 0x1f0   :  { %205 = vpow2.f32 %v162_v51 }
 0x1f1   :  { %207 = vpow2.f32 %v153_v54 }
 0x1f6   :  { %v206_v52 = vpop.eup %205 }
 0x1f7   :  { %v164_v53 = vsel %vm146_vm11, %v206_v52, 0.0  ;;  %v208_v55 = vpop.eup %207 }
 0x1f8   :  { %165 = vadd.xlane.f32.xlu2 %v164_v53  ;;  %v155_v57 = vmul.f32 %v208_v55, %v151_v56 }
 0x26b   :  { %v166_v58 = vpop.xlane.xlu2 %165 }
 0x26c   :  { %v167_v59 = vadd.f32 %v166_v58, %v155_v57 }
 0x26e   :  { %169 = vst.msk [vmem:[#allocation5] sm:$0xff] %vm118_vm10, %v167_v59 }
 0x275   :  { %v175_v60 = vld [vmem:[#allocation5] sm:$0xff] }
 0x276   :  { %209 = vlog2.f32 %v175_v60 }
 0x27c   :  { %v210_v61 = vpop.eup %209 }
 0x27d   :  { %v177_v62 = vmul.f32 0.6931472, %v210_v61 }
 0x27f   :  { %v178_v0 = vadd.f32 %v177_v62, %v174_v63 }
 0x281   :  { %v180_v2 = vsub.f32 %v178_v0, %v179_v1 }
 0x283   :  { %181 = vst.msk [vmem:[%s346_s4] sm:$0xff] %vm118_vm10, %v180_v2 }
 0x284   :  { %186 = vsyncpa [#allocation9], 1 }
 0x285   :  { %187 = vsyncpa [#allocation11], 1 }

</bundles_post_ra>
